<compile_context>
chip_gen: v7x
topology: tpu7x:2x2x1
jax: 0.10.0
libtpu: 0.0.40
codegen_flags: <defaults>
</compile_context>

<pallas_src>
import jax
import jax.numpy as jnp
from jax import lax
from jax.experimental import pallas as pl
from jax.experimental.pallas import tpu as pltpu

_BN_EPS = 1e-5
_VMEM_LIMIT_BYTES = 48 * 1024 * 1024    # > v5e/v6e default scoped limits, < v7x 64 MiB
_BLOCK_BUDGET_BYTES = 12 * 1024 * 1024  # double-buffered in+out blocks per grid step
_BLOCK_TARGET_BYTES = 1 * 1024 * 1024   # ~HBM-roofline knee for Pallas block sizes


def _divisors(v):
    ds = set()
    i = 1
    while i * i <= v:
        if v % i == 0:
            ds.add(i)
            ds.add(v // i)
        i += 1
    return sorted(ds)


def _choose_cout_tile(cout):
    # Bound the (Cout_t, TS) f32 epilogue and give full MXU tiles for big Cout.
    if cout > 512 and cout % 256 == 0:
        return 256
    return cout


def _choose_tiles(n, cin, cout_t, hw, itemsize):
    """Pick (bn, ts, hw_padded): batch elems per step, spatial tile, padded HW."""

    def step_bytes(bn, ts):
        # double-buffered x block + out block (w/b are negligible).
        return 2 * bn * (cin + cout_t) * ts * itemsize

    if hw % 128 == 0:
        hw_p = hw
    elif step_bytes(1, hw) <= _BLOCK_BUDGET_BYTES:
        hw_p = hw                              # full-extent spatial block, no padding
    else:
        hw_p = ((hw + 127) // 128) * 128       # pad; padded zero lanes are sliced off

    if hw_p % 128 == 0:
        cands = [128 * d for d in _divisors(hw_p // 128)]
    else:
        cands = [hw_p]

    fitting = [t for t in cands if step_bytes(1, t) <= _BLOCK_BUDGET_BYTES]
    ts = max(fitting) if fitting else min(cands)

    bn = 1
    for d in _divisors(n):                     # grow batch-per-step toward the target
        if step_bytes(d, ts) > _BLOCK_BUDGET_BYTES:
            break
        bn = d
        if step_bytes(d, ts) >= _BLOCK_TARGET_BYTES:
            break
    return bn, ts, hw_p


def _stats_kernel(x_ref, gram_ref, sumx_ref):
    # x_ref:    (Bn, Cin, TS)  spatial tile of a group of Bn batch elements
    # gram_ref: (1, Cin, Cin)  this group's running X @ X^T partial
    # sumx_ref: (1, Cin, 1)    this group's running per-channel sum partial
    @pl.when(pl.program_id(1) == 0)
    def _init():
        gram_ref[...] = jnp.zeros_like(gram_ref)
        sumx_ref[...] = jnp.zeros_like(sumx_ref)

    bn, cin, _ = x_ref.shape
    g_acc = jnp.zeros((cin, cin), jnp.float32)
    s_acc = jnp.zeros((cin, 1), jnp.float32)
    for i in range(bn):                        # static unroll, Bn is small
        x = x_ref[i]                           # (Cin, TS)
        # Contract the lane axis of both operands directly: X @ X^T without
        # materialising a (TS, Cin) transpose (saves XLU traffic + vregs).
        g_acc = g_acc + lax.dot_general(
            x, x, dimension_numbers=(((1,), (1,)), ((), ())),
            preferred_element_type=jnp.float32)
        s_acc = s_acc + jnp.sum(x.astype(jnp.float32), axis=-1, keepdims=True)
    gram_ref[0] += g_acc
    sumx_ref[0] += s_acc


def _conv_bn_relu_kernel(x_ref, w_ref, b_ref, o_ref):
    # x_ref: (Bn, Cin, TS); w_ref: (Cout_t, Cin) BN-folded weight;
    # b_ref: (Cout_t, 1) BN-folded bias (f32); o_ref: (Bn, Cout_t, TS)
    w = w_ref[...]
    b = b_ref[...]
    for i in range(x_ref.shape[0]):            # static unroll over Bn
        y = jnp.dot(w, x_ref[i], preferred_element_type=jnp.float32)  # (Cout_t, TS)
        o_ref[i] = jnp.maximum(y + b, 0.0).astype(o_ref.dtype)


def conv1x1_bn_relu(x_nchw, weight, gamma, beta):
    """x_nchw: (N, Cin, H, W); weight: (Cout, Cin) (1x1 conv kernel squeezed);
    gamma/beta: (Cout,). Returns (N, Cout, H, W) = ReLU(BN_train(Conv1x1(x)))."""
    n, cin, h, w_sp = x_nchw.shape
    cout = weight.shape[0]
    hw = h * w_sp
    m = n * hw                                  # true per-channel element count

    cout_t = _choose_cout_tile(cout)
    itemsize = jnp.dtype(x_nchw.dtype).itemsize
    bn, ts, hw_p = _choose_tiles(n, cin, cout_t, hw, itemsize)
    n_g = n // bn
    n_s = hw_p // ts
    n_ct = cout // cout_t

    # NCHW -> (N, Cin, H*W): contiguous reshape; zero-pad lanes only if needed
    # (zeros don't perturb colsum/Gram; padded columns are sliced off at the end).
    x3 = x_nchw.reshape(n, cin, hw)
    if hw_p != hw:
        x3 = jnp.pad(x3, ((0, 0), (0, 0), (0, hw_p - hw)))

    # ---------- pass 1: per-group batch statistics (colsum + Gram) ----------
    gram_parts, sumx_parts = pl.pallas_call(
        _stats_kernel,
        out_shape=(jax.ShapeDtypeStruct((n_g, cin, cin), jnp.float32),
                   jax.ShapeDtypeStruct((n_g, cin, 1), jnp.float32)),
        grid=(n_g, n_s),
        in_specs=[pl.BlockSpec((bn, cin, ts), lambda g, s: (g, 0, s))],
        out_specs=(pl.BlockSpec((1, cin, cin), lambda g, s: (g, 0, 0)),
                   pl.BlockSpec((1, cin, 1), lambda g, s: (g, 0, 0))),
        compiler_params=pltpu.CompilerParams(
            dimension_semantics=("parallel", "arbitrary"),
            vmem_limit_bytes=_VMEM_LIMIT_BYTES),
    )(x3)

    # ---------- tiny fold math (Cin/Cout sized), all f32, plain JAX ----------
    gram = jnp.sum(gram_parts, axis=0)          # (Cin, Cin)
    sumx = jnp.sum(sumx_parts, axis=0)          # (Cin, 1)
    w_mat = weight.astype(jnp.float32)          # (Cout, Cin)
    mean_x = sumx[:, 0] / m                     # (Cin,)
    mean_y = w_mat @ mean_x                     # (Cout,)  E[y]
    ey2 = jnp.einsum('oi,ij,oj->o', w_mat, gram / m, w_mat)   # (Cout,)  E[y^2]
    # Clamp: E[y^2] - E[y]^2 can go slightly negative in f32 (cancellation).
    var = jnp.maximum(ey2 - mean_y * mean_y, 0.0)   # biased var (BN training mode)
    inv_std = lax.rsqrt(var + _BN_EPS)
    scale = gamma.astype(jnp.float32) * inv_std
    shift = beta.astype(jnp.float32) - mean_y * scale
    w_eff = (scale[:, None] * w_mat).astype(x_nchw.dtype)     # BN folded into weight
    b_eff = shift.reshape(cout, 1)                            # (Cout, 1), f32

    # ---------- pass 2: fused conv(1x1) + BN + ReLU, streamed, lane-dense ----------
    # Grid order (group, spatial, cout-tile): the x block index is constant over
    # the innermost cout-tile axis, so x is only fetched once per (group, spatial).
    if n_ct == 1:
        # Constant block index -> a second buffer is pure VMEM waste.
        w_spec = pl.BlockSpec((cout_t, cin), lambda g, s, c: (c, 0),
                              pipeline_mode=pl.Buffered(1))
        b_spec = pl.BlockSpec((cout_t, 1), lambda g, s, c: (c, 0),
                              pipeline_mode=pl.Buffered(1))
    else:
        w_spec = pl.BlockSpec((cout_t, cin), lambda g, s, c: (c, 0))
        b_spec = pl.BlockSpec((cout_t, 1), lambda g, s, c: (c, 0))

    out3 = pl.pallas_call(
        _conv_bn_relu_kernel,
        out_shape=jax.ShapeDtypeStruct((n, cout, hw_p), x_nchw.dtype),
        grid=(n_g, n_s, n_ct),
        in_specs=[pl.BlockSpec((bn, cin, ts), lambda g, s, c: (g, 0, s)),
                  w_spec,
                  b_spec],
        out_specs=pl.BlockSpec((bn, cout_t, ts), lambda g, s, c: (g, c, s)),
        compiler_params=pltpu.CompilerParams(
            dimension_semantics=("parallel", "parallel", "parallel"),
            vmem_limit_bytes=_VMEM_LIMIT_BYTES),
    )(x3, w_eff, b_eff)

    if hw_p != hw:
        out3 = out3[:, :, :hw]
    return out3.reshape(n, cout, h, w_sp)


if __name__ == "__main__":
    key = jax.random.PRNGKey(0)
    kx, kw = jax.random.split(key)

    N, C_IN, H, W = 2, 4, 16, 16
    C_OUT = 8

    x = jax.random.normal(kx, (N, C_IN, H, W), dtype=jnp.float32)

    # nn.Conv2d(C_IN, C_OUT, 1, bias=False) weight (C_OUT, C_IN, 1, 1) squeezed;
    # deterministic kaiming-uniform-like synthetic init.
    bound = 1.0 / jnp.sqrt(jnp.float32(C_IN))
    conv_w = jax.random.uniform(kw, (C_OUT, C_IN), dtype=jnp.float32,
                                minval=-bound, maxval=bound)

    # nn.BatchNorm2d default init: weight (gamma) = 1, bias (beta) = 0.
    gamma = jnp.ones((C_OUT,), dtype=jnp.float32)
    beta = jnp.zeros((C_OUT,), dtype=jnp.float32)

    out = conv1x1_bn_relu(x, conv_w, gamma, beta)
    jax.block_until_ready(out)

    # Pure-JAX reference: Conv1x1 -> BatchNorm2d (training batch stats) -> ReLU.
    y_ref = jnp.einsum('oc,nchw->nohw', conv_w, x)
    mu = y_ref.mean(axis=(0, 2, 3))
    var = y_ref.var(axis=(0, 2, 3))
    ref = (y_ref - mu[None, :, None, None]) \
        * (gamma / jnp.sqrt(var + _BN_EPS))[None, :, None, None] \
        + beta[None, :, None, None]
    ref = jnp.maximum(ref, 0.0)

    assert out.shape == (N, C_OUT, H, W)
    assert bool(jnp.all(out >= 0.0))                       # ReLU
    assert bool(jnp.all(jnp.isfinite(out)))
    assert bool(jnp.allclose(out, ref, rtol=2e-2, atol=2e-2)), \
        float(jnp.max(jnp.abs(out - ref)))
    print("KERNEL_OK")
</pallas_src>

<mosaic_0001>
module attributes {stable_mosaic.version = 11 : i64} {
  func.func @_stats_kernel(%arg0: i32, %arg1: i32, %arg2: memref<2x4x256xf32, #tpu.memory_space<vmem>>, %arg3: memref<1x4x4xf32, #tpu.memory_space<vmem>>, %arg4: memref<1x4x1xf32, #tpu.memory_space<vmem>>) attributes {dimension_semantics = [#tpu.dimension_semantics<parallel>, #tpu.dimension_semantics<arbitrary>], iteration_bounds = array<i64: 1, 1>, scalar_prefetch = 0 : i64, scratch_operands = 0 : i64, tpu.core_type = #tpu.core_type<tc>, window_params = [{transform_indices = @transform_0, window_bounds = array<i64: 2, 4, 256>}, {transform_indices = @transform_1, window_bounds = array<i64: 1, 4, 4>}, {transform_indices = @transform_2, window_bounds = array<i64: 1, 4, 1>}]} {
    %c0_i32 = arith.constant 0 : i32
    %0 = arith.cmpi eq, %arg1, %c0_i32 : i32
    %1 = arith.extui %0 : i1 to i32
    %c0_i32_0 = arith.constant 0 : i32
    %2 = arith.cmpi ne, %1, %c0_i32_0 : i32
    scf.if %2 {
      %cst_22 = arith.constant 0.000000e+00 : f32
      %31 = vector.broadcast %cst_22 : f32 to vector<1x4x4xf32>
      %c0_23 = arith.constant 0 : index
      %c0_24 = arith.constant 0 : index
      %c0_25 = arith.constant 0 : index
      %32 = vector.load %arg3[%c0_23, %c0_24, %c0_25] : memref<1x4x4xf32, #tpu.memory_space<vmem>>, vector<1x4x4xf32>
      tpu.vector_store %arg3[%c0_23, %c0_24, %c0_25], %31 {strides = array<i32>} : memref<1x4x4xf32, #tpu.memory_space<vmem>>, vector<1x4x4xf32>,
      %cst_26 = arith.constant 0.000000e+00 : f32
      %33 = vector.broadcast %cst_26 : f32 to vector<1x4x1xf32>
      %c0_27 = arith.constant 0 : index
      %c0_28 = arith.constant 0 : index
      %c0_29 = arith.constant 0 : index
      %34 = vector.load %arg4[%c0_27, %c0_28, %c0_29] : memref<1x4x1xf32, #tpu.memory_space<vmem>>, vector<1x4x1xf32>
      tpu.vector_store %arg4[%c0_27, %c0_28, %c0_29], %33 {strides = array<i32>} : memref<1x4x1xf32, #tpu.memory_space<vmem>>, vector<1x4x1xf32>,
    } else {
    }
    %cst = arith.constant 0.000000e+00 : f32
    %3 = vector.broadcast %cst : f32 to vector<4x4xf32>
    %cst_1 = arith.constant 0.000000e+00 : f32
    %4 = vector.broadcast %cst_1 : f32 to vector<4x1xf32>
    %c0 = arith.constant 0 : index
    %c0_2 = arith.constant 0 : index
    %c0_3 = arith.constant 0 : index
    %5 = vector.load %arg2[%c0, %c0_2, %c0_3] : memref<2x4x256xf32, #tpu.memory_space<vmem>>, vector<1x4x256xf32>
    %6 = vector.shape_cast %5 : vector<1x4x256xf32> to vector<4x256xf32>
    %cst_4 = arith.constant dense<0.000000e+00> : vector<4x4xf32>
    %7 = tpu.matmul %6, %6, %cst_4 {dimension_numbers = #tpu.dot_dimension_numbers<[1], [1], [0], [0], [0, 0, 1, 0], [], []>} : vector<4x256xf32>, vector<4x256xf32>, vector<4x4xf32> -> vector<4x4xf32>
    %8 = arith.addf %3, %7 : vector<4x4xf32>
    %cst_5 = arith.constant dense<0.000000e+00> : vector<4xf32>
    %9 = vector.multi_reduction <add>, %6, %cst_5 [1] : vector<4x256xf32> to vector<4xf32>
    %10 = vector.shape_cast %9 : vector<4xf32> to vector<4x1xf32>
    %11 = arith.addf %4, %10 : vector<4x1xf32>
    %c1 = arith.constant 1 : index
    %c0_6 = arith.constant 0 : index
    %c0_7 = arith.constant 0 : index
    %12 = vector.load %arg2[%c1, %c0_6, %c0_7] : memref<2x4x256xf32, #tpu.memory_space<vmem>>, vector<1x4x256xf32>
    %13 = vector.shape_cast %12 : vector<1x4x256xf32> to vector<4x256xf32>
    %cst_8 = arith.constant dense<0.000000e+00> : vector<4x4xf32>
    %14 = tpu.matmul %13, %13, %cst_8 {dimension_numbers = #tpu.dot_dimension_numbers<[1], [1], [0], [0], [0, 0, 1, 0], [], []>} : vector<4x256xf32>, vector<4x256xf32>, vector<4x4xf32> -> vector<4x4xf32>
    %15 = arith.addf %8, %14 : vector<4x4xf32>
    %cst_9 = arith.constant dense<0.000000e+00> : vector<4xf32>
    %16 = vector.multi_reduction <add>, %13, %cst_9 [1] : vector<4x256xf32> to vector<4xf32>
    %17 = vector.shape_cast %16 : vector<4xf32> to vector<4x1xf32>
    %18 = arith.addf %11, %17 : vector<4x1xf32>
    %c0_10 = arith.constant 0 : index
    %c0_11 = arith.constant 0 : index
    %c0_12 = arith.constant 0 : index
    %19 = vector.load %arg3[%c0_10, %c0_11, %c0_12] : memref<1x4x4xf32, #tpu.memory_space<vmem>>, vector<1x4x4xf32>
    %20 = vector.shape_cast %19 : vector<1x4x4xf32> to vector<4x4xf32>
    %21 = arith.addf %20, %15 : vector<4x4xf32>
    %c0_13 = arith.constant 0 : index
    %c0_14 = arith.constant 0 : index
    %c0_15 = arith.constant 0 : index
    %22 = vector.load %arg3[%c0_13, %c0_14, %c0_15] : memref<1x4x4xf32, #tpu.memory_space<vmem>>, vector<1x4x4xf32>
    %23 = vector.shape_cast %22 : vector<1x4x4xf32> to vector<4x4xf32>
    %24 = vector.shape_cast %21 : vector<4x4xf32> to vector<1x4x4xf32>
    tpu.vector_store %arg3[%c0_13, %c0_14, %c0_15], %24 {strides = array<i32>} : memref<1x4x4xf32, #tpu.memory_space<vmem>>, vector<1x4x4xf32>,
    %c0_16 = arith.constant 0 : index
    %c0_17 = arith.constant 0 : index
    %c0_18 = arith.constant 0 : index
    %25 = vector.load %arg4[%c0_16, %c0_17, %c0_18] : memref<1x4x1xf32, #tpu.memory_space<vmem>>, vector<1x4x1xf32>
    %26 = vector.shape_cast %25 : vector<1x4x1xf32> to vector<4x1xf32>
    %27 = arith.addf %26, %18 : vector<4x1xf32>
    %c0_19 = arith.constant 0 : index
    %c0_20 = arith.constant 0 : index
    %c0_21 = arith.constant 0 : index
    %28 = vector.load %arg4[%c0_19, %c0_20, %c0_21] : memref<1x4x1xf32, #tpu.memory_space<vmem>>, vector<1x4x1xf32>
    %29 = vector.shape_cast %28 : vector<1x4x1xf32> to vector<4x1xf32>
    %30 = vector.shape_cast %27 : vector<4x1xf32> to vector<1x4x1xf32>
    tpu.vector_store %arg4[%c0_19, %c0_20, %c0_21], %30 {strides = array<i32>} : memref<1x4x1xf32, #tpu.memory_space<vmem>>, vector<1x4x1xf32>,
    return
  }
  func.func @transform_0(%arg0: i32, %arg1: i32) -> (i32, i32, i32) {
    %c0_i32 = arith.constant 0 : i32
    %c0_i32_0 = arith.constant 0 : i32
    return %arg0, %c0_i32, %arg1 : i32, i32, i32
  }
  func.func @transform_1(%arg0: i32, %arg1: i32) -> (i32, i32, i32) {
    %c0_i32 = arith.constant 0 : i32
    %c0_i32_0 = arith.constant 0 : i32
    %c0_i32_1 = arith.constant 0 : i32
    return %arg0, %c0_i32, %c0_i32_0 : i32, i32, i32
  }
  func.func @transform_2(%arg0: i32, %arg1: i32) -> (i32, i32, i32) {
    %c0_i32 = arith.constant 0 : i32
    %c0_i32_0 = arith.constant 0 : i32
    %c0_i32_1 = arith.constant 0 : i32
    return %arg0, %c0_i32, %c0_i32_0 : i32, i32, i32
  }
}

</mosaic_0001>

<bundles_post_ra>
// kernel: tpu_custom_call.1
= control target key start
LH: loop header
LB: loop body
LE: loop exit
PB: predicated region body
PF: predicated region fallthrough
CT: control target
= control target key end

     0   :  { %8 = vsyncpa [#allocation3], 0  ;;  %s332_s0 = inlined_call_operand.hbm [shape: f32[2,4,256], index: 0, kind: input, shape index: {}]   ;;  %s333_s1 = inlined_call_operand.hbm [shape: f32[1,4,4], index: 1, kind: output, shape index: {0}]   ;;  %s334_s2 = inlined_call_operand.vmem [shape: f32[1,4,1], index: 2, kind: output, shape index: {1}]  }
   0x1   :  { %9 = vsyncpa [#allocation4], 0  ;;  %s277_s9 = smov [#allocation2]   ;;  %s229_s13 = scalar_lea.hbm %s332_s0, 256 }
   0x2   :  { %s15_s10 = sshll.u32 %s277_s9, 4  ;;  %p230_p0 = scmp.ne.s32.totalorder %s332_s0, %s229_s13  ;;  %s16_s10 = int_to_ptr.vmem [resolvable:$true] %s15_s10 }
   0x3   :  { %p233_p1 = scmp.lt.u32.totalorder %s229_s13, %s332_s0 }
   0x5   :  { %p235_p2 = pnand %p233_p1, %p230_p0 }
   0x7   :  { %238 = shalt.err (!%p235_p2)
}
   0x8   :  { %s239_s18 = scalar_lea.vmem %s16_s10, 256  ;;  %p244_p4 = scmp.lt.s32.totalorder %s16_s10, %s16_s10 }
   0x9   :  { %p240_p3 = scmp.ne.s32.totalorder %s16_s10, %s239_s18  ;;  %p245_p5 = scmp.lt.s32.totalorder %s239_s18, %s239_s18 }
   0xb   :  { %p246_p6 = por %p245_p5, %p244_p4 }
   0xd   :  { %p247_p7 = pnand %p246_p6, %p240_p3 }
   0xf   :  { %250 = shalt.err (!%p247_p7)
}
  0x10   :  { %s278_s19 = smov 128   ;;  %s279_s20 = smov 8  }
  0x11   :  { %21 = dma.hbm_to_vmem [thread:$0]  %s332_s0, 256, %s16_s10, [#allocation3], %s278_s19, %s278_s19, %s279_s20  }
  0x12   :  { %273 = dma.done.wait [#allocation3], 256  }
  0x13   :  { %274 = vsyncadd [#allocation3], 4294967040  ;;  %vm29_vm0 = vcmask 27648   ;;  %v280_v0 = vmov 0.0   ;;  %vm37_vm1 = vcmask 1043456   ;;  %v45_v1 = vld [vmem:[#allocation2 + $0x8] sm:$0xff] }
  0x14   :  { %30 = vst.msk [vmem:[#allocation5] sm:$0xf] %vm29_vm0, %v280_v0  ;;  %v33_v2 = vld [vmem:[#allocation2] sm:$0xff]  ;;  %v47_v3 = vcombine.high %v45_v1, %v45_v1  ;;  %v189_v7 = vsel %vm37_vm1, %v45_v1, 0.0  ;;  %vm31_vm2 = vcmask 3072   ;;  %s281_s28 = smov [#allocation5]  }
  0x15   :  { %v35_v4 = vcombine.high %v33_v2, %v33_v2  ;;  %v38_v5 = vsel %vm37_vm1, %v33_v2, 0.0  ;;  %32 = vst.msk [vmem:[%s334_s2] sm:$0xf] %vm31_vm2, %v280_v0  ;;  %s209_s29 = sshll.u32 %s281_s28, 4  ;;  %s210_s29 = int_to_ptr.vmem [resolvable:$true] %s209_s29 }
  0x16   :  { %49 = vmatprep.subr.mxu0 %v47_v3  ;;  %v190_v8 = vsel %vm37_vm1, %v47_v3, 0.0  ;;  %113 = vmatprep.mubr.f32.mxu0 %v47_v3  ;;  %s251_s30 = scalar_lea.vmem %s210_s29, 64  ;;  %p256_p9 = scmp.lt.s32.totalorder %s210_s29, %s210_s29 }
  0x17   :  { %119 = vmatprep.subr.mxu1 %v35_v4  ;;  %v39_v6 = vsel %vm37_vm1, %v35_v4, 0.0  ;;  %50 = vmatpush1.xpose.msra.mxu0 %v45_v1  ;;  %v191_v10 = vadd.f32 %v190_v8, %v189_v7  ;;  %p252_p8 = scmp.ne.s32.totalorder %s210_s29, %s251_s30  ;;  %p257_p10 = scmp.lt.s32.totalorder %s251_s30, %s251_s30 }
  0x18   :  { %120 = vmatpush1.xpose.msra.mxu1 %v33_v2  ;;  %v40_v9 = vadd.f32 %v39_v6, %v38_v5  ;;  %183 = vmatprep.mubr.f32.mxu1 %v35_v4 }
  0x19   :  { %p258_p11 = por %p257_p10, %p256_p9 }
  0x1a   :  { %41 = vadd.xlane.f32.xlu0 %v40_v9  ;;  %114 = vmatmul.mubr.f32.vlgmr.msra.gmra.mrb[0].mxu0 %v45_v1 }
  0x1b   :  { %184 = vmatmul.mubr.f32.vlgmr.msra.gmra.mrb[0].mxu1 %v33_v2  ;;  %v195_v18 = vld [vmem:[#allocation5] sm:$0xf]  ;;  %p259_p12 = pnand %p258_p11, %p252_p8 }
  0x1c   :  { %v199_v13 = vld [vmem:[%s334_s2] sm:$0xf] }
  0x1e   :  { %192 = vadd.xlane.f32.xlu0 %v191_v10 }
  0xa7   :  { %v42_v11 = vpop.xlane.xlu0 %41 }
  0xab   :  { %v193_v12 = vpop.xlane.xlu0 %192 }
  0xac   :  { %v194_v14 = vadd.f32 %v193_v12, %v42_v11 }
  0xae   :  { %v200_v15 = vadd.f32 %v199_v13, %v194_v14 }
  0xb0   :  { %202 = vst.msk [vmem:[%s334_s2] sm:$0xf] %vm31_vm2, %v200_v15 }
  0xed   :  { %v115_v16 = vpop.f32.mrb[0].mxu0 }
  0xee   :  { %v185_v17 = vpop.f32.mrb[0].mxu1  ;;  %v117_v20 = vpop.f32.mrb[1].mxu0 }
  0xef   :  { %v186_v19 = vadd.f32 %v185_v17, %v115_v16  ;;  %v187_v21 = vpop.f32.mrb[1].mxu1 }
  0xf1   :  { %v196_v22 = vadd.f32 %v195_v18, %v186_v19 }
  0xf3   :  { %198 = vst.msk [vmem:[#allocation5] sm:$0xf] %vm29_vm0, %v196_v22 }
  0xf4   :  { %262 = shalt.err (!%p259_p12)
}
  0xf5   :  { %s263_s4 = scalar_lea.hbm %s333_s1, 64 }
  0xf6   :  { %p264_p13 = scmp.ne.s32.totalorder %s333_s1, %s263_s4  ;;  %p267_p0 = scmp.lt.u32.totalorder %s263_s4, %s333_s1 }
  0xf8   :  { %p269_p1 = pnand %p267_p0, %p264_p13 }
  0xfa   :  { %272 = shalt.err (!%p269_p1)
}
  0xfb   :  { %212 = dma.vmem_to_hbm [thread:$0]  %s210_s29, 64, %s333_s1, [#allocation4]  }
  0xfc   :  { %275 = dma.done.wait [#allocation4], 64  }
  0xfd   :  { %276 = vsyncadd [#allocation4], 4294967232 }
  0xfe   :  { %220 = vsyncpa [#allocation3], 1 }
  0xff   :  { %221 = vsyncpa [#allocation4], 1 }

</bundles_post_ra>
